<compile_context>
chip_gen: v5e
topology: v5e:2x2
jax: 0.10.0
libtpu: 0.0.40
codegen_flags: <defaults>
</compile_context>

<pallas_src>
import math
import functools

import jax
import jax.numpy as jnp
from jax.experimental import pallas as pl
from jax.experimental.pallas import tpu as pltpu


# --------------------- single-buffered (grid-invariant) specs --------------- #

_SINGLE_BUFFER_OK = None


def _single_buffer_supported():
    """Probe once whether pipeline_mode=pl.Buffered(1) lowers on this build."""
    global _SINGLE_BUFFER_OK
    if _SINGLE_BUFFER_OK is not None:
        return _SINGLE_BUFFER_OK
    try:
        def k(x_ref, o_ref):
            o_ref[...] = x_ref[...] + 1.0

        f = pl.pallas_call(
            k,
            out_shape=jax.ShapeDtypeStruct((16, 128), jnp.float32),
            grid=(2,),
            in_specs=[pl.BlockSpec((8, 128), lambda i: (0, 0),
                                   pipeline_mode=pl.Buffered(1))],
            out_specs=pl.BlockSpec((8, 128), lambda i: (i, 0)),
        )
        jax.block_until_ready(f(jnp.zeros((8, 128), jnp.float32)))
        _SINGLE_BUFFER_OK = True
    except Exception:
        _SINGLE_BUFFER_OK = False
    return _SINGLE_BUFFER_OK


def _const_spec(shape, index_map):
    """BlockSpec for a grid-invariant operand; single-buffered when supported."""
    if _single_buffer_supported():
        return pl.BlockSpec(shape, index_map, pipeline_mode=pl.Buffered(1))
    return pl.BlockSpec(shape, index_map)


def _layer_vmem_limit_bytes(S, H, F, tq):
    """Explicit scoped-VMEM limit sized from the fused layer's resident set."""
    bf16, f32 = 2, 4
    weights = (H * 3 * H + H * H + H * F + F * H) * bf16   # single-buffered
    biases = (3 * H + H + F + H + 4 * H) * f32
    acts = 2 * S * H * bf16 + 2 * tq * H * bf16 + 2 * S * f32
    scratch = S * 2 * H * bf16 + tq * H * f32              # K|V cache + ctx
    temps = tq * F * f32 + 2 * tq * S * f32 + 4 * tq * H * f32
    est = weights + biases + acts + scratch + temps
    return int(min(64 * 2**20, max(8 * 2**20, 2 * est)))


# ----------------------------- Pallas kernels ------------------------------ #

def _embed_ln_kernel(tok_ref, pos_ref, g_ref, b_ref, o_ref, *, eps):
    # LayerNorm(tok_emb + pos_emb) for one batch row; bf16 store.
    x = tok_ref[0] + pos_ref[...]                               # (S, H) f32
    mu = jnp.mean(x, axis=-1, keepdims=True)
    var = jnp.mean(jnp.square(x - mu), axis=-1, keepdims=True)
    y = (x - mu) * jax.lax.rsqrt(var + eps) * g_ref[...] + b_ref[...]
    o_ref[0] = y.astype(o_ref.dtype)


def _encoder_layer_kernel(x_ref, bias_ref, wqkv_ref, bqkv_ref, wo_ref, bo_ref,
                          ln1g_ref, ln1b_ref, w1_ref, b1_ref, w2_ref, b2_ref,
                          ln2g_ref, ln2b_ref, o_ref, kv_ref, ctx_ref,
                          *, num_heads, head_dim, q_tile, eps):
    # Fully fused encoder layer:
    #   QKV proj -> per-head attention -> WO proj -> +res -> LN1
    #   -> FFN (matmul + GELU + matmul) -> +res -> LN2
    H = num_heads * head_dim
    qi = pl.program_id(1)

    # ---- K/V projection for the whole sequence: computed once per batch row
    #      (query-tile axis is innermost / "arbitrary") and cached in VMEM.
    @pl.when(qi == 0)
    def _():
        kv = jnp.dot(x_ref[0], wqkv_ref[:, H:],                 # (S, 2H) f32 acc
                     preferred_element_type=jnp.float32) + bqkv_ref[:, H:]
        kv_ref[...] = kv.astype(jnp.bfloat16)

    # ---- Q projection for this query tile (1/sqrt(head_dim) folded into wqkv)
    row0 = pl.multiple_of(qi * q_tile, q_tile)
    xq = x_ref[0, pl.ds(row0, q_tile), :]                       # (tq, H) bf16
    q = (jnp.dot(xq, wqkv_ref[:, :H], preferred_element_type=jnp.float32)
         + bqkv_ref[:, :H]).astype(jnp.bfloat16)
    bias = bias_ref[0]                                          # (1, S) mask bias

    # ---- per-head attention; context written into VMEM scratch slices
    #      (bounded liveness, no concat); WO stays one fused (tq,H)@(H,H) matmul.
    for h in range(num_heads):                                  # static head slices
        sl = slice(h * head_dim, (h + 1) * head_dim)
        k_h = kv_ref[:, sl]                                     # (S, hd) bf16
        v_h = kv_ref[:, H + h * head_dim: H + (h + 1) * head_dim]
        s = jax.lax.dot_general(q[:, sl], k_h, (((1,), (1,)), ((), ())),
                                preferred_element_type=jnp.float32)   # (tq, S)
        s = s + bias
        m = jnp.max(s, axis=-1, keepdims=True)
        p = jnp.exp(s - m)
        # denominator >= 1 (the max element contributes exp(0)); safe even for
        # fully-masked rows because the mask bias is finite (-1e9), not -inf.
        denom = jnp.sum(p, axis=-1, keepdims=True)
        p = p * pl.reciprocal(denom, approx=True)               # EUP slot
        ctx_ref[:, sl] = jnp.dot(p.astype(jnp.bfloat16), v_h,
                                 preferred_element_type=jnp.float32)

    attn = jnp.dot(ctx_ref[...].astype(jnp.bfloat16), wo_ref[...],
                   preferred_element_type=jnp.float32) + bo_ref[...]

    # residual + LN1 (f32 math)
    y = attn + xq.astype(jnp.float32)
    mu = jnp.mean(y, axis=-1, keepdims=True)
    var = jnp.mean(jnp.square(y - mu), axis=-1, keepdims=True)
    y = (y - mu) * jax.lax.rsqrt(var + eps) * ln1g_ref[...] + ln1b_ref[...]

    # FFN: matmul + bias + exact (erf) GELU + matmul + bias
    hmid = jnp.dot(y.astype(jnp.bfloat16), w1_ref[...],
                   preferred_element_type=jnp.float32) + b1_ref[...]
    hmid = 0.5 * hmid * (1.0 + jax.lax.erf(hmid * 0.7071067811865476))
    z = jnp.dot(hmid.astype(jnp.bfloat16), w2_ref[...],
                preferred_element_type=jnp.float32) + b2_ref[...]

    # residual + LN2; store bf16 (halves HBM traffic between layers)
    z = z + y
    mu = jnp.mean(z, axis=-1, keepdims=True)
    var = jnp.mean(jnp.square(z - mu), axis=-1, keepdims=True)
    o_ref[0] = ((z - mu) * jax.lax.rsqrt(var + eps) * ln2g_ref[...]
                + ln2b_ref[...]).astype(o_ref.dtype)


# ------------------------------- wrappers ----------------------------------- #

def embed_layernorm(tok, pos, g, b, eps=1e-5):
    B, S, H = tok.shape
    return pl.pallas_call(
        functools.partial(_embed_ln_kernel, eps=eps),
        out_shape=jax.ShapeDtypeStruct((B, S, H), jnp.bfloat16),
        grid=(B,),
        in_specs=[
            pl.BlockSpec((1, S, H), lambda i: (i, 0, 0)),
            _const_spec((S, H), lambda i: (0, 0)),
            _const_spec((1, H), lambda i: (0, 0)),
            _const_spec((1, H), lambda i: (0, 0)),
        ],
        out_specs=pl.BlockSpec((1, S, H), lambda i: (i, 0, 0)),
        compiler_params=pltpu.CompilerParams(dimension_semantics=("parallel",)),
    )(tok, pos, g, b)


def encoder_layer(x, mask_bias, p, *, num_heads, eps=1e-5, max_q_tile=128):
    B, S, H = x.shape
    FFN = p["w1"].shape[1]
    head_dim = H // num_heads
    tq = S if S <= max_q_tile else max_q_tile
    assert S % tq == 0, "sequence length must be a multiple of the query tile"
    NQ = S // tq

    kern = functools.partial(_encoder_layer_kernel, num_heads=num_heads,
                             head_dim=head_dim, q_tile=tq, eps=eps)

    def cspec(shape):
        return _const_spec(shape, lambda b, q: (0,) * len(shape))

    return pl.pallas_call(
        kern,
        out_shape=jax.ShapeDtypeStruct((B, S, H), jnp.bfloat16),
        grid=(B, NQ),
        in_specs=[
            pl.BlockSpec((1, S, H), lambda b, q: (b, 0, 0)),    # activations
            pl.BlockSpec((1, 1, S), lambda b, q: (b, 0, 0)),    # mask bias
            cspec((H, 3 * H)), cspec((1, 3 * H)),               # wqkv, bqkv
            cspec((H, H)), cspec((1, H)),                       # wo, bo
            cspec((1, H)), cspec((1, H)),                       # ln1 g, b
            cspec((H, FFN)), cspec((1, FFN)),                   # w1, b1
            cspec((FFN, H)), cspec((1, H)),                     # w2, b2
            cspec((1, H)), cspec((1, H)),                       # ln2 g, b
        ],
        out_specs=pl.BlockSpec((1, tq, H), lambda b, q: (b, q, 0)),
        scratch_shapes=[
            pltpu.VMEM((S, 2 * H), jnp.bfloat16),   # cached K|V for this row
            pltpu.VMEM((tq, H), jnp.float32),       # per-tile attention context
        ],
        compiler_params=pltpu.CompilerParams(
            dimension_semantics=("parallel", "arbitrary"),
            vmem_limit_bytes=_layer_vmem_limit_bytes(S, H, FFN, tq),
        ),
    )(x, mask_bias, p["wqkv"], p["bqkv"], p["wo"], p["bo"],
      p["ln1_g"], p["ln1_b"], p["w1"], p["b1"], p["w2"], p["b2"],
      p["ln2_g"], p["ln2_b"])


# --------------------------- parameters / forward --------------------------- #

def init_params(key, vocab, max_pos, H, FFN, n_layers, task_heads_config,
                num_heads):
    head_dim = H // num_heads
    scale = 1.0 / math.sqrt(head_dim)
    keys = iter(jax.random.split(key, 6 + 6 * n_layers + len(task_heads_config)))

    def nrm(shape):
        return jax.random.normal(next(keys), shape, jnp.float32) * 0.02

    params = {
        "tok_emb": nrm((vocab, H)),
        "pos_emb": nrm((max_pos, H)),
        "emb_ln_g": jnp.ones((1, H), jnp.float32),
        "emb_ln_b": jnp.zeros((1, H), jnp.float32),
        "layers": [],
        "heads": {},
    }
    for _ in range(n_layers):
        wq, wk, wv = nrm((H, H)), nrm((H, H)), nrm((H, H))
        # fused QKV weight with 1/sqrt(head_dim) folded into the Q columns
        wqkv = jnp.concatenate([wq * scale, wk, wv], axis=1)
        bqkv = jnp.zeros((1, 3 * H), jnp.float32)               # zero bias (scaled Q part is still zero)
        params["layers"].append({
            "wqkv": wqkv.astype(jnp.bfloat16),
            "bqkv": bqkv,
            "wo": nrm((H, H)).astype(jnp.bfloat16),
            "bo": jnp.zeros((1, H), jnp.float32),
            "ln1_g": jnp.ones((1, H), jnp.float32),
            "ln1_b": jnp.zeros((1, H), jnp.float32),
            "w1": nrm((H, FFN)).astype(jnp.bfloat16),
            "b1": jnp.zeros((1, FFN), jnp.float32),
            "w2": nrm((FFN, H)).astype(jnp.bfloat16),
            "b2": jnp.zeros((1, H), jnp.float32),
            "ln2_g": jnp.ones((1, H), jnp.float32),
            "ln2_b": jnp.zeros((1, H), jnp.float32),
        })
    for name, ncls in task_heads_config.items():
        params["heads"][name] = {
            "w": nrm((H, ncls)),
            "b": jnp.zeros((ncls,), jnp.float32),
        }
    return params


def multitask_forward(params, input_ids, attention_mask, task_name, *, num_heads):
    B, S = input_ids.shape

    # --- shared encoder --------------------------------------------------- #
    # embedding gather stays in XLA (no clean Pallas gather win at these shapes)
    tok = jnp.take(params["tok_emb"], input_ids, axis=0)          # (B, S, H) f32
    pos = params["pos_emb"][:S]                                   # (S, H)
    x = embed_layernorm(tok, pos, params["emb_ln_g"], params["emb_ln_b"])  # bf16

    # additive attention-mask bias precomputed once for all layers / heads
    mask_bias = ((attention_mask.astype(jnp.float32) - 1.0) * 1e9)[:, None, :]

    for layer in params["layers"]:
        x = encoder_layer(x, mask_bias, layer, num_heads=num_heads)

    # --- pooled_output = last_hidden_state[:, 0, :] ------------------------ #
    pooled = x[:, 0, :].astype(jnp.float32)                       # (B, H) CLS

    # TODO(synk): nn.Dropout(0.1) is identity at inference; training-mode dropout not applied.

    # --- task head: left to XLA — a dedicated pallas_call costs more in
    #     launch/DMA overhead than the tiny (B,H)@(H,ncls) matmul itself.
    head = params["heads"][task_name]
    return pooled @ head["w"] + head["b"]


# ---------------------------------- main ------------------------------------ #

if __name__ == "__main__":
    # Demo shapes are intentionally tiny (sub-(8,128)-tile); production sizing
    # should use H % 128 == 0, S >= 128, head_dim = 64 to be lane-dense.
    B, S = 2, 8
    H, NUM_HEADS, FFN, N_LAYERS = 32, 2, 64, 2
    VOCAB, MAX_POS = 64, 16
    task_heads_config = {"topic_classification": 4, "sentiment": 3}

    key = jax.random.PRNGKey(0)
    pkey, ikey = jax.random.split(key)

    params = init_params(pkey, VOCAB, MAX_POS, H, FFN, N_LAYERS,
                         task_heads_config, NUM_HEADS)
    input_ids = jax.random.randint(ikey, (B, S), 0, VOCAB, dtype=jnp.int32)
    attention_mask = jnp.ones((B, S), dtype=jnp.int32)

    logits = multitask_forward(params, input_ids, attention_mask,
                               "topic_classification", num_heads=NUM_HEADS)
    logits = jax.block_until_ready(logits)
    assert logits.shape == (B, task_heads_config["topic_classification"])
    assert logits.dtype == jnp.float32
    assert bool(jnp.all(jnp.isfinite(logits)))

    print("KERNEL_OK")
</pallas_src>

<mosaic_0001>
module attributes {stable_mosaic.version = 11 : i64} {
  func.func @k(%arg0: i32, %arg1: memref<8x128xf32, #tpu.memory_space<vmem>>, %arg2: memref<8x128xf32, #tpu.memory_space<vmem>>) attributes {dimension_semantics = [#tpu.dimension_semantics<arbitrary>], iteration_bounds = array<i64: 2>, scalar_prefetch = 0 : i64, scratch_operands = 0 : i64, tpu.core_type = #tpu.core_type<tc>, window_params = [{pipeline_mode = #tpu.pipeline_mode<synchronous>, transform_indices = @transform_0, window_bounds = array<i64: 8, 128>}, {transform_indices = @transform_1, window_bounds = array<i64: 8, 128>}]} {
    %c0 = arith.constant 0 : index
    %c0_0 = arith.constant 0 : index
    %0 = vector.load %arg1[%c0, %c0_0] : memref<8x128xf32, #tpu.memory_space<vmem>>, vector<8x128xf32>
    %cst = arith.constant 1.000000e+00 : f32
    %1 = vector.broadcast %cst : f32 to vector<8x128xf32>
    %2 = arith.addf %0, %1 : vector<8x128xf32>
    %c0_1 = arith.constant 0 : index
    %c0_2 = arith.constant 0 : index
    %3 = vector.load %arg2[%c0_1, %c0_2] : memref<8x128xf32, #tpu.memory_space<vmem>>, vector<8x128xf32>
    tpu.vector_store %arg2[%c0_1, %c0_2], %2 {strides = array<i32>} : memref<8x128xf32, #tpu.memory_space<vmem>>, vector<8x128xf32>,
    return
  }
  func.func @transform_0(%arg0: i32) -> (i32, i32) {
    %c0_i32 = arith.constant 0 : i32
    %c0_i32_0 = arith.constant 0 : i32
    %c0_i32_1 = arith.constant 0 : i32
    return %c0_i32, %c0_i32_0 : i32, i32
  }
  func.func @transform_1(%arg0: i32) -> (i32, i32) {
    %c0_i32 = arith.constant 0 : i32
    %c0_i32_0 = arith.constant 0 : i32
    return %arg0, %c0_i32 : i32, i32
  }
}

module attributes {stable_mosaic.version = 11 : i64} {
  func.func @_embed_ln_kernel(%arg0: i32, %arg1: memref<1x8x32xf32, #tpu.memory_space<vmem>>, %arg2: memref<8x32xf32, #tpu.memory_space<vmem>>, %arg3: memref<1x32xf32, #tpu.memory_space<vmem>>, %arg4: memref<1x32xf32, #tpu.memory_space<vmem>>, %arg5: memref<1x8x32xbf16, #tpu.memory_space<vmem>>) attributes {dimension_semantics = [#tpu.dimension_semantics<parallel>], iteration_bounds = array<i64: 2>, scalar_prefetch = 0 : i64, scratch_operands = 0 : i64, tpu.core_type = #tpu.core_type<tc>, window_params = [{transform_indices = @transform_0, window_bounds = array<i64: 1, 8, 32>}, {pipeline_mode = #tpu.pipeline_mode<synchronous>, transform_indices = @transform_1, window_bounds = array<i64: 8, 32>}, {pipeline_mode = #tpu.pipeline_mode<synchronous>, transform_indices = @transform_2, window_bounds = array<i64: 1, 32>}, {pipeline_mode = #tpu.pipeline_mode<synchronous>, transform_indices = @transform_3, window_bounds = array<i64: 1, 32>}, {transform_indices = @transform_4, window_bounds = array<i64: 1, 8, 32>}]} {
    %c0 = arith.constant 0 : index
    %c0_0 = arith.constant 0 : index
    %c0_1 = arith.constant 0 : index
    %0 = vector.load %arg1[%c0, %c0_0, %c0_1] : memref<1x8x32xf32, #tpu.memory_space<vmem>>, vector<1x8x32xf32>
    %1 = vector.shape_cast %0 : vector<1x8x32xf32> to vector<8x32xf32>
    %c0_2 = arith.constant 0 : index
    %c0_3 = arith.constant 0 : index
    %2 = vector.load %arg2[%c0_2, %c0_3] : memref<8x32xf32, #tpu.memory_space<vmem>>, vector<8x32xf32>
    %3 = arith.addf %1, %2 : vector<8x32xf32>
    %cst = arith.constant dense<0.000000e+00> : vector<8xf32>
    %4 = vector.multi_reduction <add>, %3, %cst [1] : vector<8x32xf32> to vector<8xf32>
    %5 = vector.shape_cast %4 : vector<8xf32> to vector<8x1xf32>
    %cst_4 = arith.constant 3.200000e+01 : f32
    %6 = vector.broadcast %cst_4 : f32 to vector<8x1xf32>
    %7 = arith.divf %5, %6 : vector<8x1xf32>
    %8 = vector.broadcast %7 : vector<8x1xf32> to vector<8x32xf32>
    %9 = arith.subf %3, %8 : vector<8x32xf32>
    %10 = arith.mulf %9, %9 : vector<8x32xf32>
    %cst_5 = arith.constant dense<0.000000e+00> : vector<8xf32>
    %11 = vector.multi_reduction <add>, %10, %cst_5 [1] : vector<8x32xf32> to vector<8xf32>
    %12 = vector.shape_cast %11 : vector<8xf32> to vector<8x1xf32>
    %cst_6 = arith.constant 3.200000e+01 : f32
    %13 = vector.broadcast %cst_6 : f32 to vector<8x1xf32>
    %14 = arith.divf %12, %13 : vector<8x1xf32>
    %15 = vector.broadcast %7 : vector<8x1xf32> to vector<8x32xf32>
    %16 = arith.subf %3, %15 : vector<8x32xf32>
    %cst_7 = arith.constant 9.99999974E-6 : f32
    %17 = vector.broadcast %cst_7 : f32 to vector<8x1xf32>
    %18 = arith.addf %14, %17 : vector<8x1xf32>
    %19 = math.rsqrt %18 : vector<8x1xf32>
    %20 = vector.broadcast %19 : vector<8x1xf32> to vector<8x32xf32>
    %21 = arith.mulf %16, %20 : vector<8x32xf32>
    %c0_8 = arith.constant 0 : index
    %c0_9 = arith.constant 0 : index
    %22 = vector.load %arg3[%c0_8, %c0_9] : memref<1x32xf32, #tpu.memory_space<vmem>>, vector<1x32xf32>
    %23 = vector.broadcast %22 : vector<1x32xf32> to vector<8x32xf32>
    %24 = arith.mulf %21, %23 : vector<8x32xf32>
    %c0_10 = arith.constant 0 : index
    %c0_11 = arith.constant 0 : index
    %25 = vector.load %arg4[%c0_10, %c0_11] : memref<1x32xf32, #tpu.memory_space<vmem>>, vector<1x32xf32>
    %26 = vector.broadcast %25 : vector<1x32xf32> to vector<8x32xf32>
    %27 = arith.addf %24, %26 : vector<8x32xf32>
    %28 = arith.truncf %27 : vector<8x32xf32> to vector<8x32xbf16>
    %c0_12 = arith.constant 0 : index
    %c0_13 = arith.constant 0 : index
    %c0_14 = arith.constant 0 : index
    %29 = vector.load %arg5[%c0_12, %c0_13, %c0_14] : memref<1x8x32xbf16, #tpu.memory_space<vmem>>, vector<1x8x32xbf16>
    %30 = vector.shape_cast %29 : vector<1x8x32xbf16> to vector<8x32xbf16>
    %31 = vector.shape_cast %28 : vector<8x32xbf16> to vector<1x8x32xbf16>
    tpu.vector_store %arg5[%c0_12, %c0_13, %c0_14], %31 {strides = array<i32>} : memref<1x8x32xbf16, #tpu.memory_space<vmem>>, vector<1x8x32xbf16>,
    return
  }
  func.func @transform_0(%arg0: i32) -> (i32, i32, i32) {
    %c0_i32 = arith.constant 0 : i32
    %c0_i32_0 = arith.constant 0 : i32
    %c0_i32_1 = arith.constant 0 : i32
    return %arg0, %c0_i32, %c0_i32_0 : i32, i32, i32
  }
  func.func @transform_1(%arg0: i32) -> (i32, i32) {
    %c0_i32 = arith.constant 0 : i32
    %c0_i32_0 = arith.constant 0 : i32
    %c0_i32_1 = arith.constant 0 : i32
    return %c0_i32, %c0_i32_0 : i32, i32
  }
  func.func @transform_2(%arg0: i32) -> (i32, i32) {
    %c0_i32 = arith.constant 0 : i32
    %c0_i32_0 = arith.constant 0 : i32
    %c0_i32_1 = arith.constant 0 : i32
    return %c0_i32, %c0_i32_0 : i32, i32
  }
  func.func @transform_3(%arg0: i32) -> (i32, i32) {
    %c0_i32 = arith.constant 0 : i32
    %c0_i32_0 = arith.constant 0 : i32
    %c0_i32_1 = arith.constant 0 : i32
    return %c0_i32, %c0_i32_0 : i32, i32
  }
  func.func @transform_4(%arg0: i32) -> (i32, i32, i32) {
    %c0_i32 = arith.constant 0 : i32
    %c0_i32_0 = arith.constant 0 : i32
    %c0_i32_1 = arith.constant 0 : i32
    return %arg0, %c0_i32, %c0_i32_0 : i32, i32, i32
  }
}

</mosaic_0001>

<bundles_post_ra>
// kernel: tpu_custom_call.1
= control target key start
LH: loop header
LB: loop body
LE: loop exit
PB: predicated region body
PF: predicated region fallthrough
CT: control target
= control target key end

     0   :  { %6 = vsyncpa [#allocation3], 0  ;;  %s441_s0 = inlined_call_operand.hbm [shape: f32[8,128], index: 0, kind: input, shape index: {}]   ;;  %s442_s1 = inlined_call_operand.hbm [shape: f32[16,128], index: 1, kind: output, shape index: {}]  }
   0x1   :  { %7 = vsyncpa [#allocation4], 0 }
   0x2   :  { %9 = vsyncpa [#allocation4 + $0x1], 0  ;;  %s357_s6 = smov 0   ;;  %s359_s7 = smov 0  }
   0x3   :  { %s361_s8 = smov 0   ;;  %s363_s9 = smov 0  }
   0x4 LB: > { %s378_s10 = sadd.s32 4294967295, %s344_s9   ;;  %s188_s11 = sadd.s32 4294967294, %s344_s9   ;;  %s344_s9 = sphi %s363_s9, %s448_s9   ;;  %s340_s8 = sphi %s361_s8, %s447_s8   ;;  %s336_s7 = sphi %s359_s7, %s446_s7   ;;  %s332_s6 = sphi %s357_s6, %s445_s6  }
   0x5   : > { %s382_s12 = sadd.s32 1, %s344_s9   ;;  %s43_s13 = sadd.s32 1, %s340_s8 }
   0x6   : > { %s40_s14 = ssub.s32 %s344_s9, %s382_s12  ;;  %p53_p0 = scmp.ne.s32.totalorder %s340_s8, %s336_s7 }
   0x7   : > { %p41_p1 = scmp.eq.s32.totalorder %s40_s14, 0  ;;  %p54_p2 = scmp.eq.s32.totalorder %s378_s10, 1 }
   0x8   : > { %p59_p3 = scmp.ne.s32.totalorder %s336_s7, %s332_s6  ;;  %p60_p4 = scmp.eq.s32.totalorder %s188_s11, 1 }
   0x9   : > { %s393_s15 = scalar_select %p41_p1, %s340_s8, %s43_s13  }
   0xa   : > { %p395_p5 = por %p54_p2, %p53_p0  ;;  %p399_p6 = por %p60_p4, %p59_p3 }
   0xb   : > { %p189_p7 = scmp.ge.s32.totalorder %s344_s9, 1  ;;  %p67_p8 = scmp.lt.s32.totalorder %s344_s9, 3 }
   0xc   : > { %p212_p9 = scmp.eq.s32.totalorder %s378_s10, 0  ;;  %s79_s20 = sshll.u32 %s441_s0, 4  ;;  %s80_s20 = int_to_ptr.hbm [resolvable:$true] %s79_s20 }
   0xd   : > { %p68_p10 = pnand %p189_p7, %p67_p8  ;;  %s346_s21 = smov [#allocation2]  }
   0xe   : > { %s81_s22 = sshll.u32 %s346_s21, 4  ;;  %s82_s22 = int_to_ptr.vmem [resolvable:$true] %s81_s22 }
   0xf   : > { %p204_p11 = pneg %p68_p10  ;;  %94 = sbr.rel (%p68_p10) target bundleno = 37 (0x25), region = 24 }
  0x11   : > { %p205_p12 = pnand %p212_p9, %p204_p11 }
  0x13   : > { %207 = dma.hbm_to_vmem [thread:$0]  (!%p205_p12), %s80_s20, 128, %s82_s22, [#allocation3]  }
  0x14   : > { %323 = dma.done.wait (%p212_p9), [#allocation3], 128  }
  0x15   : > { %325 = vsyncadd (%p212_p9), [#allocation3], 4294967168  ;;  %s107_s23 = sand.u32 1, %s336_s7   ;;  %s195_s24 = sshll.u32 %s378_s10, 3  ;;  %v110_v0 = vld [vmem:[#allocation2] sm:$0xff] }
  0x16   : > { %s193_s25 = sshll.u32 %s107_s23, 3  ;;  %s124_s28 = scalar_lea.hbm %s442_s1, %s195_s24  ;;  %v111_v1 = vadd.f32 1.0, %v110_v0 }
  0x17   : > { %s109_s29 = scalar_lea.vmem [#allocation5], %s193_s25  ;;  %s128_s2 = sshll.u32 %s124_s28, 4  ;;  %s129_s2 = int_to_ptr.hbm [resolvable:$true] %s128_s2 }
  0x18   : > { %s126_s30 = sshll.u32 %s109_s29, 4  ;;  %112 = vst [vmem:[%s109_s29] sm:$0xff] %v111_v1  ;;  %s114_s3 = scalar_lea.sflag [#allocation4], %s107_s23  ;;  %s127_s30 = int_to_ptr.vmem [resolvable:$true] %s126_s30 }
  0x19   : > { %s292_s4 = sshra.s32 %s129_s2, 4  ;;  %s298_s13 = scalar_lea.hbm %s442_s1, 16  ;;  %s293_s4 = int_to_ptr.hbm [resolvable:$true] %s292_s4 }
  0x1a   : > { %s294_s5 = scalar_lea.hbm %s293_s4, 8  ;;  %p299_p2 = scmp.lt.s32.totalorder %s293_s4, %s442_s1 }
  0x1b   : > { %p295_p13 = scmp.ne.s32.totalorder %s293_s4, %s294_s5  ;;  %p300_p3 = scmp.lt.s32.totalorder %s298_s13, %s294_s5 }
  0x1d   : > { %p296_p0 = pnand %p295_p13, %p395_p5  ;;  %p301_p4 = por %p300_p3, %p299_p2 }
  0x1f   : > { %p297_p1 = pneg %p296_p0 }
  0x21   : > { %p302_p7 = pnand %p301_p4, %p297_p1 }
  0x23   : > { %305 = shalt.err (!%p302_p7)
}
  0x24   : > { %202 = dma.vmem_to_hbm [thread:$0]  (%p395_p5), %s127_s30, 128, %s129_s2, %s114_s3  }
  0x25 PF: > { %p214_p8 = scmp.ge.s32.totalorder %s344_s9, 2  ;;  %s140_s19 = sand.u32 1, %s332_s6  }
  0x26   : > { %s141_s20 = scalar_lea.sflag [#allocation4], %s140_s19 }
  0x27   : > { %p209_p9 = pnand %p214_p8, %p399_p6 }
  0x29   : > { %p210_p10 = pneg %p209_p9 }
  0x2b   : > { %327 = dma.done.wait (%p210_p10), %s141_s20, 128  }
  0x2c   : > { %329 = vsyncadd (%p210_p10), %s141_s20, 4294967168  ;;  %p12_p11 = scmp.ge.s32.totalorder %s382_s12, 4   ;;  %s445_s6 = smov %s336_s7 }
  0x2d   : > { %s446_s7 = smov %s340_s8  ;;  %s447_s8 = smov %s393_s15 }
  0x2e   : > { %s448_s9 = smov %s382_s12  ;;  %14 = sbr.rel (!%p12_p11) target bundleno = 4 (0x4), region = 61 }
  0x33   :  { %147 = vsyncpa [#allocation3], 1 }
  0x34   :  { %149 = vsyncpa [#allocation3 + $0x1], 1 }
  0x35   :  { %150 = vsyncpa [#allocation4], 1 }
  0x36   :  { %152 = vsyncpa [#allocation4 + $0x1], 1 }

// kernel: tpu_custom_call.1
= control target key start
LH: loop header
LB: loop body
LE: loop exit
PB: predicated region body
PF: predicated region fallthrough
CT: control target
= control target key end

     0   :  { %9 = vsyncpa [#allocation3], 0  ;;  %s756_s0 = inlined_call_operand.hbm [shape: f32[2,8,32], index: 0, kind: input, shape index: {}]   ;;  %s757_s1 = inlined_call_operand.hbm [shape: f32[8,32], index: 1, kind: input, shape index: {}]   ;;  %s758_s2 = inlined_call_operand.vmem [shape: f32[1,32], index: 2, kind: input, shape index: {}]   ;;  %s759_s3 = inlined_call_operand.vmem [shape: f32[1,32], index: 3, kind: input, shape index: {}]   ;;  %s760_s4 = inlined_call_operand.hbm [shape: bf16[2,8,32], index: 4, kind: output, shape index: {}]  }
   0x1   :  { %11 = vsyncpa [#allocation3 + $0x1], 0 }
   0x2   :  { %12 = vsyncpa [#allocation6], 0 }
   0x3   :  { %13 = vsyncpa [#allocation4], 0 }
   0x4   :  { %15 = vsyncpa [#allocation4 + $0x1], 0  ;;  %s609_s15 = smov 0   ;;  %s611_s16 = smov 0  }
   0x5   :  { %s613_s17 = smov 0   ;;  %s615_s18 = smov 0  }
   0x6 LB: > { %s630_s19 = sadd.s32 4294967295, %s580_s18   ;;  %s372_s20 = sadd.s32 4294967294, %s580_s18   ;;  %s580_s18 = sphi %s615_s18, %s770_s18   ;;  %s576_s17 = sphi %s613_s17, %s769_s17   ;;  %s572_s16 = sphi %s611_s16, %s768_s16   ;;  %s568_s15 = sphi %s609_s15, %s767_s15  }
   0x7   : > { %p41_p0 = scmp.ne.s32.totalorder %s572_s16, %s568_s15  ;;  %p42_p1 = scmp.eq.s32.totalorder %s630_s19, 0 }
   0x8   : > { %p128_p2 = scmp.eq.s32.totalorder %s630_s19, 1  ;;  %p134_p3 = scmp.eq.s32.totalorder %s372_s20, 1 }
   0x9   : > { %p639_p4 = por %p42_p1, %p41_p0  ;;  %p373_p5 = scmp.ge.s32.totalorder %s580_s18, 1 }
   0xa   : > { %p644_p6 = por %p134_p3, %p41_p0  ;;  %p141_p7 = scmp.lt.s32.totalorder %s580_s18, 3 }
   0xb   : > { %s153_s25 = sshll.u32 %s757_s1, 4  ;;  %s582_s27 = smov [#allocation5]   ;;  %s154_s25 = int_to_ptr.hbm [resolvable:$true] %s153_s25 }
   0xc   : > { %p652_p8 = pnand %p373_p5, %p141_p7  ;;  %s155_s28 = sshll.u32 %s582_s27, 4  ;;  %s156_s28 = int_to_ptr.vmem [resolvable:$true] %s155_s28 }
   0xd   : > { %s662_s29 = sadd.s32 1, %s580_s18   ;;  %s28_s30 = sadd.s32 1, %s576_s17 }
   0xe   : > { %p394_p10 = pneg %p652_p8  ;;  %s25_s5 = ssub.s32 %s580_s18, %s662_s29 }
   0xf   : > { %p26_p12 = scmp.eq.s32.totalorder %s25_s5, 0  ;;  %p35_p13 = scmp.ne.s32.totalorder %s576_s17, %s572_s16 }
  0x10   : > { %p395_p11 = pnand %p394_p10, %p42_p1  ;;  %p36_p0 = scmp.eq.s32.totalorder %s580_s18, 0 }
  0x11   : > { %s671_s6 = scalar_select %p26_p12, %s576_s17, %s28_s30  }
  0x12   : > { %397 = dma.hbm_to_vmem [thread:$0]  (!%p395_p11), %s154_s25, 128, %s156_s28, [#allocation6]  }
  0x13   : > { %p675_p3 = por %p128_p2, %p35_p13  ;;  %p407_p5 = scmp.lt.s32.totalorder %s580_s18, 2 }
  0x14   : > { %s172_s8 = sand.u32 1, %s576_s17   ;;  %s377_s9 = sshll.u32 %s580_s18, 3 }
  0x15   : > { %p37_p7 = por %p36_p0, %p35_p13  ;;  %s376_s10 = sshll.u32 %s172_s8, 3 }
  0x16   : > { %s180_s13 = scalar_lea.hbm %s756_s0, %s377_s9  ;;  %s176_s20 = scalar_lea.vmem [#allocation2], %s376_s10 }
  0x17   : > { %s182_s14 = sshll.u32 %s180_s13, 4  ;;  %s184_s23 = sshll.u32 %s176_s20, 4  ;;  %s183_s14 = int_to_ptr.hbm [resolvable:$true] %s182_s14  ;;  %s185_s23 = int_to_ptr.vmem [resolvable:$true] %s184_s23 }
  0x18   : > { %p685_p10 = pnand %p407_p5, %p37_p7  ;;  %s173_s25 = scalar_lea.sflag [#allocation3], %s172_s8 }
  0x19   : > { %s480_s27 = sshra.s32 %s183_s14, 4  ;;  %s487_s9 = scalar_lea.hbm %s756_s0, 16  ;;  %s481_s27 = int_to_ptr.hbm [resolvable:$true] %s480_s27 }
  0x1a   : > { %s482_s28 = scalar_lea.hbm %s481_s27, 8  ;;  %p484_p11 = pneg %p685_p10 }
  0x1b   : > { %p483_p2 = scmp.ne.s32.totalorder %s481_s27, %s482_s28  ;;  %p488_p0 = scmp.lt.s32.totalorder %s481_s27, %s756_s0 }
  0x1c   : > { %p489_p5 = scmp.lt.s32.totalorder %s487_s9, %s482_s28 }
  0x1d   : > { %p485_p12 = pnand %p484_p11, %p483_p2 }
  0x1e   : > { %p490_p7 = por %p489_p5, %p488_p0 }
  0x1f   : > { %p486_p13 = pneg %p485_p12 }
  0x21   : > { %p491_p9 = pnand %p490_p7, %p486_p13 }
  0x23   : > { %494 = shalt.err (!%p491_p9)
}
  0x24   : > { %401 = dma.hbm_to_vmem [thread:$0]  (!%p685_p10), %s183_s14, 128, %s185_s23, %s173_s25  }
  0x25   : > { %193 = sbr.rel (%p652_p8) target bundleno = 321 (0x141), region = 36  ;;  %s702_s8 = sand.u32 (!%p652_p8), 1, %s572_s16  }
  0x26   : > { %s379_s12 = sshll.u32 (!%p652_p8), %s702_s8, 3  ;;  %s196_s13 = scalar_lea.sflag (!%p652_p8), [#allocation3], %s702_s8 }
  0x27   : > { %s199_s20 = scalar_lea.vmem (!%p652_p8), [#allocation2], %s379_s12 }
  0x2a   : > { %555 = dma.done.wait (%p639_p4), %s196_s13, 128  }
  0x2b   : > { %557 = vsyncadd (%p639_p4), %s196_s13, 4294967168 }
  0x2c   : > { %559 = dma.done.wait (%p42_p1), [#allocation6], 128  }
  0x2d   : > { %561 = vsyncadd (%p42_p1), [#allocation6], 4294967168  ;;  %v230_v0 = vld [vmem:[%s199_s20] sm:$0xff]  ;;  %v231_v1 = vld [vmem:[#allocation5] sm:$0xff]  ;;  %vm233_vm0 = vcmask 261120   ;;  %v583_v4 = vmov 32.0  }
  0x2e   : > { %v232_v2 = vadd.f32 %v231_v1, %v230_v0  ;;  %446 = vrcp.f32 %v583_v4  ;;  %s381_s21 = sshll.u32 %s702_s8, 2  ;;  %s383_s26 = sshll.u32 %s630_s19, 2  ;;  %v444_v25 = vld [vmem:[%s758_s2] ss:$0 sm:$0xff]  ;;  %vm274_vm5 = vcmask 257024  }
  0x2f   : > { %v445_v27 = vld [vmem:[%s759_s3] ss:$0 sm:$0xff]  ;;  %s287_s30 = scalar_lea.hbm %s760_s4, %s383_s26  ;;  %s229_s5 = scalar_lea.vmem [#allocation7], %s381_s21 }
  0x30   : > { %v234_v3 = vsel %vm233_vm0, %v232_v2, 0.0  ;;  %s289_s19 = sshll.u32 %s229_s5, 4  ;;  %s291_s9 = sshll.u32 %s287_s30, 4  ;;  %s290_s19 = int_to_ptr.vmem [resolvable:$true] %s289_s19  ;;  %s292_s9 = int_to_ptr.hbm [resolvable:$true] %s291_s9 }
  0x31   : > { %235 = vadd.xlane.f32.xlu0 %v234_v3  ;;  %s277_s10 = scalar_lea.sflag [#allocation4], %s702_s8  ;;  %s524_s11 = sshra.s32 %s292_s9, 4  ;;  %s525_s11 = int_to_ptr.hbm [resolvable:$true] %s524_s11 }
  0x32   : > { %s526_s12 = scalar_lea.hbm %s525_s11, 4  ;;  %s530_s21 = scalar_lea.hbm %s760_s4, 8 }
  0x33   : > { %p527_p1 = scmp.ne.s32.totalorder %s525_s11, %s526_s12  ;;  %p531_p9 = scmp.lt.s32.totalorder %s525_s11, %s760_s4 }
  0x34   : > { %v447_v5 = vpop.eup %446  ;;  %p532_p10 = scmp.lt.s32.totalorder %s530_s21, %s526_s12 }
  0x35   : > { %v238_v6 = vmul.f32 32.0, %v447_v5  ;;  %vm242_vm1 = vweird.f32 %v447_v5  ;;  %p528_p4 = pnand %p527_p1, %p675_p3 }
  0x36   : > { %p533_p2 = por %p532_p10, %p531_p9 }
  0x37   : > { %v239_v7 = vsub.f32 1.0, %v238_v6  ;;  %p529_p8 = pneg %p528_p4 }
  0x39   : > { %v240_v8 = vmul.f32 %v447_v5, %v239_v7  ;;  %p534_p11 = pnand %p533_p2, %p529_p8 }
  0x3b   : > { %v241_v9 = vadd.f32 %v447_v5, %v240_v8 }
  0x3d   : > { %v243_v10 = vsel %vm242_vm1, %v447_v5, %v241_v9 }
  0xa4   : > { %v236_v11 = vpop.xlane.xlu0 %235 }
  0xa5   : > { %v244_v12 = vmul.f32 %v243_v10, %v236_v11 }
  0xa7   : > { %v245_v13 = vsub.f32 %v232_v2, %v244_v12 }
  0xa9   : > { %v246_v14 = vmul.f32 %v245_v13, %v245_v13 }
  0xab   : > { %v247_v15 = vsel %vm233_vm0, %v246_v14, 0.0 }
  0xac   : > { %248 = vadd.xlane.f32.xlu0 %v247_v15 }
 0x11f   : > { %v249_v16 = vpop.xlane.xlu0 %248 }
 0x120   : > { %v250_v17 = vmul.f32 %v249_v16, %v243_v10 }
 0x122   : > { %v251_v18 = vadd.f32 1e-05, %v250_v17 }
 0x124   : > { %448 = vrsqrt.f32 %v251_v18  ;;  %vm258_vm3 = vweird.f32 %v251_v18 }
 0x12a   : > { %v449_v19 = vpop.eup %448 }
 0x12b   : > { %v253_v20 = vmul.f32 %v449_v19, %v251_v18  ;;  %vm259_vm2 = vweird.f32 %v449_v19 }
 0x12c   : > { %vm260_vm4 = vmor %vm258_vm3, %vm259_vm2 }
 0x12d   : > { %v254_v21 = vmul.f32 %v449_v19, %v253_v20 }
 0x12f   : > { %v255_v22 = vmul.f32 0.5, %v254_v21 }
 0x131   : > { %v256_v23 = vsub.f32 1.5, %v255_v22 }
 0x133   : > { %v257_v24 = vmul.f32 %v449_v19, %v256_v23 }
 0x135   : > { %v261_v26 = vsel %vm260_vm4, %v449_v19, %v257_v24 }
 0x136   : > { %v262_v28 = vmul.f32 %v261_v26, %v245_v13 }
 0x138   : > { %v267_v29 = vmul.f32 %v444_v25, %v262_v28 }
 0x13a   : > { %v272_v30 = vadd.f32 %v445_v27, %v267_v29 }
 0x13c   : > { %v273_v31 = vpack.c.bf16 %v272_v30, %v272_v30 }
 0x13e   : > { %275 = vst.msk [vmem:[%s229_s5] sm:$0xf] %vm274_vm5, %v273_v31 }
 0x13f   : > { %537 = shalt.err (!%p534_p11)
}
 0x140   : > { %392 = dma.vmem_to_hbm [thread:$0]  (%p675_p3), %s290_s19, 64, %s292_s9, %s277_s10  }
 0x141 PF: > { %s303_s8 = sand.u32 1, %s568_s15   ;;  %p766_p12 = scmp.ge.s32.totalorder %s580_s18, 2 }
 0x142   : > { %s304_s23 = scalar_lea.sflag [#allocation4], %s303_s8 }
 0x143   : > { %p403_p13 = pnand %p766_p12, %p644_p6 }
 0x145   : > { %p404_p0 = pneg %p403_p13 }
 0x147   : > { %563 = dma.done.wait (%p404_p0), %s304_s23, 64  }
 0x148   : > { %565 = vsyncadd (%p404_p0), %s304_s23, 4294967232  ;;  %p18_p5 = scmp.ge.s32.totalorder %s662_s29, 4   ;;  %s767_s15 = smov %s572_s16 }
 0x149   : > { %s768_s16 = smov %s576_s17  ;;  %s769_s17 = smov %s671_s6 }
 0x14a   : > { %s770_s18 = smov %s662_s29  ;;  %20 = sbr.rel (!%p18_p5) target bundleno = 6 (0x6), region = 85 }
 0x14f   :  { %310 = vsyncpa [#allocation3], 1 }
 0x150   :  { %312 = vsyncpa [#allocation3 + $0x1], 1 }
 0x151   :  { %313 = vsyncpa [#allocation6], 1 }
 0x152   :  { %314 = vsyncpa [#allocation4], 1 }
 0x153   :  { %316 = vsyncpa [#allocation4 + $0x1], 1 }

</bundles_post_ra>
